<compile_context>
chip_gen: v6e
topology: v6e:2x2x1
jax: 0.10.0
libtpu: 0.0.40
codegen_flags: <defaults>
</compile_context>

<pallas_src>
import functools

import jax
import jax.numpy as jnp
from jax.experimental import pallas as pl
from jax.experimental.pallas import tpu as pltpu


def _round_up(x, m):
    return (x + m - 1) // m * m


def _conv_gelu_kernel(x_ref, w_ref, b_ref, o_ref, *, tile_l, win_l):
    """One (image, spatial-tile) grid point.

    x_ref: (KH*Cin=9, Lx_pad) kh-pre-stacked zero-padded flat plane (resident per image)
    w_ref: (KW=3, Cout, KH*Cin=9) per-kw weight slabs (resident)
    b_ref: (Cout, 1) bias column (resident)
    o_ref: (Cout, TILE_L) lane-dense output tile
    """
    t = pl.program_id(1)
    base = pl.multiple_of(t * tile_l, 128)            # 128-aligned window start
    x_win = x_ref[:, pl.ds(base, win_l)]              # (9, WIN_L) one aligned load

    # kh is already folded into the sublane layout by the wrapper; only the 3 kw
    # lane shifts remain, so the 3x3 conv is 3 (Cout,9)@(9,TILE_L) MXU matmuls.
    acc = jnp.dot(w_ref[0], x_win[:, 0:tile_l],
                  preferred_element_type=jnp.float32)
    acc = acc + jnp.dot(w_ref[1], x_win[:, 1:tile_l + 1],
                        preferred_element_type=jnp.float32)
    acc = acc + jnp.dot(w_ref[2], x_win[:, 2:tile_l + 2],
                        preferred_element_type=jnp.float32)
    # TODO(synk): the two remaining unaligned lane shifts could be moved to the
    # XLU via pltpu.roll or folded into a single K=27 matmul; at Cout=8/Cin=3
    # they are not the binding cost, so the proven-simple form is kept.

    y = acc + b_ref[...]                              # (Cout, TILE_L) + (Cout, 1)

    # v1 == v2 == v3 == y; v7 = y*y + (y*0.044715)*0.7978845608 == y*(y + c)
    # out = (0.5*y) * (tanh(v7) + 1)
    c = 0.044715 * 0.7978845608028654
    o_ref[...] = ((0.5 * y) * (jnp.tanh(y * (y + c)) + 1.0)).astype(o_ref.dtype)


def fused_model(x_nchw, w_oihw, bias, *, tile_l_cap=2048):
    """x_nchw: (N, Cin, H, W); w_oihw: (Cout, Cin, 3, 3); bias: (Cout,) -> (N, Cout, H, W)."""
    N, Cin, H, W = x_nchw.shape
    Cout, Cin_w, KH, KW = w_oihw.shape
    assert (Cin_w, KH, KW) == (Cin, 3, 3)

    Wp = W + 2                     # padded width
    Lp = (H + 2) * Wp              # flattened padded-plane length
    Lo = H * Wp                    # outputs needed (incl. 2 junk columns per row)

    # Adaptive spatial tiling: smallest T that keeps tiles under the cap, so small
    # images run in one tile per image (minimal grid steps, minimal padded tail).
    T = max(1, pl.cdiv(Lo, _round_up(tile_l_cap, 128)))
    if N == 1 and Lo >= 256:
        T = max(T, 2)              # keep both v7x TensorCores busy when N == 1
    TILE_L = _round_up(pl.cdiv(Lo, T), 128)
    T = pl.cdiv(Lo, TILE_L)
    Lo_pad = T * TILE_L
    WIN_L = TILE_L + 128           # 2-lane kw halo, rounded to lane alignment
    Lx_pad = Lo_pad + 128          # base + WIN_L <= Lx_pad for every tile

    # --- cheap JAX glue: pad spatially, flatten, pre-stack the 3 kh row shifts ---
    x_pad = jnp.pad(x_nchw, ((0, 0), (0, 0), (1, 1), (1, 1)))
    x_flat = x_pad.reshape(N, Cin, Lp)
    Lsrc = max(Lp, 2 * Wp + Lx_pad)
    x_flat = jnp.pad(x_flat, ((0, 0), (0, 0), (0, Lsrc - Lp)))
    # row index = kh*Cin + ci  (3x data expansion, far from the 9x im2col matrix)
    x_stack = jnp.concatenate(
        [x_flat[:, :, kh * Wp: kh * Wp + Lx_pad] for kh in range(KH)], axis=1)

    # weights: (O, I, kh, kw) -> (kw, O, kh*Cin + ci); bias -> column vector
    w_kw = jnp.transpose(w_oihw, (3, 0, 2, 1)).reshape(KW, Cout, KH * Cin)
    b_col = bias.reshape(Cout, 1)

    kernel = functools.partial(_conv_gelu_kernel, tile_l=TILE_L, win_l=WIN_L)

    KC = KH * Cin
    block_bytes = 4 * (KC * Lx_pad + KW * Cout * 128 + Cout * 128 + Cout * TILE_L)
    vmem_limit = int(min(32 * 1024 * 1024, max(4 * 1024 * 1024, 4 * block_bytes)))

    out_flat = pl.pallas_call(
        kernel,
        out_shape=jax.ShapeDtypeStruct((N, Cout, Lo_pad), x_nchw.dtype),
        grid_spec=pltpu.PrefetchScalarGridSpec(
            num_scalar_prefetch=0,
            grid=(N, T),
            in_specs=[
                # kh-stacked padded plane of image n, resident across the T tiles
                pl.BlockSpec((None, KC, Lx_pad), lambda n, t: (n, 0, 0)),
                # weights / bias resident across the entire grid
                pl.BlockSpec((KW, Cout, KC), lambda n, t: (0, 0, 0)),
                pl.BlockSpec((Cout, 1), lambda n, t: (0, 0)),
            ],
            out_specs=pl.BlockSpec((None, Cout, TILE_L), lambda n, t: (n, 0, t)),
        ),
        compiler_params=pltpu.CompilerParams(
            dimension_semantics=("parallel", "parallel"),
            vmem_limit_bytes=vmem_limit,
        ),
        cost_estimate=pl.CostEstimate(
            flops=int(2 * N * Lo_pad * Cout * KH * KW * Cin
                      + 7 * N * Lo_pad * Cout),
            transcendentals=int(N * Lo_pad * Cout),
            bytes_accessed=int(4 * (x_stack.size + w_kw.size + b_col.size
                                    + N * Cout * Lo_pad)),
        ),
    )(x_stack, w_kw, b_col)

    # drop padded tail + the 2 junk columns per row; result is already NCHW
    out = out_flat[:, :, :Lo].reshape(N, Cout, H, Wp)[:, :, :, :W]
    return out


def _reference(x_nchw, w_oihw, bias):
    """Pure-JAX reference reproducing the PyTorch forward exactly."""
    y = jax.lax.conv_general_dilated(
        x_nchw, w_oihw, window_strides=(1, 1), padding=((1, 1), (1, 1)),
        dimension_numbers=("NCHW", "OIHW", "NCHW"))
    y = y + bias.reshape(1, -1, 1, 1)
    v4 = y * y
    v7 = v4 + (y * 0.044715) * 0.7978845608028654
    return (y * 0.5) * (jnp.tanh(v7) + 1.0)


if __name__ == "__main__":
    key = jax.random.PRNGKey(0)
    kx, kwt, kb = jax.random.split(key, 3)

    # Small shapes consistent with the module: Conv2d(3, 8, 3, padding=1)
    N, Cin, H, W = 2, 3, 32, 32
    Cout = 8

    x = jax.random.normal(kx, (N, Cin, H, W), dtype=jnp.float32)
    fan_in = Cin * 3 * 3
    bound = 1.0 / (fan_in ** 0.5)
    w = jax.random.uniform(kwt, (Cout, Cin, 3, 3), minval=-bound, maxval=bound,
                           dtype=jnp.float32)
    b = jax.random.uniform(kb, (Cout,), minval=-bound, maxval=bound,
                           dtype=jnp.float32)

    out = jax.jit(fused_model)(x, w, b)
    out = jax.block_until_ready(out)

    ref = _reference(x, w, b)
    assert out.shape == (N, Cout, H, W)
    assert jnp.allclose(out, ref, atol=1e-5, rtol=1e-5), "mismatch vs reference"

    print("KERNEL_OK")
</pallas_src>

<mosaic_0001>
module attributes {stable_mosaic.version = 11 : i64} {
  func.func @_conv_gelu_kernel(%arg0: i32, %arg1: i32, %arg2: memref<1x9x1280xf32, #tpu.memory_space<vmem>>, %arg3: memref<3x8x9xf32, #tpu.memory_space<vmem>>, %arg4: memref<8x1xf32, #tpu.memory_space<vmem>>, %arg5: memref<1x8x1152xf32, #tpu.memory_space<vmem>>) attributes {dimension_semantics = [#tpu.dimension_semantics<parallel>, #tpu.dimension_semantics<parallel>], iteration_bounds = array<i64: 2, 1>, scalar_prefetch = 0 : i64, scratch_operands = 0 : i64, tpu.core_type = #tpu.core_type<tc>, window_params = [{transform_indices = @transform_0, window_bounds = array<i64: 1, 9, 1280>}, {pipeline_mode = #tpu.pipeline_mode<synchronous>, transform_indices = @transform_1, window_bounds = array<i64: 3, 8, 9>}, {pipeline_mode = #tpu.pipeline_mode<synchronous>, transform_indices = @transform_2, window_bounds = array<i64: 8, 1>}, {transform_indices = @transform_3, window_bounds = array<i64: 1, 8, 1152>}]} {
    %c1152_i32 = arith.constant 1152 : i32
    %0 = arith.muli %arg1, %c1152_i32 : i32
    %1 = tpu.assume_multiple %0, 128 : i32
    %c0 = arith.constant 0 : index
    %c0_0 = arith.constant 0 : index
    %2 = arith.index_cast %1 : i32 to index
    %3 = vector.load %arg2[%c0, %c0_0, %2] : memref<1x9x1280xf32, #tpu.memory_space<vmem>>, vector<1x9x1280xf32>
    %4 = vector.shape_cast %3 : vector<1x9x1280xf32> to vector<9x1280xf32>
    %c0_1 = arith.constant 0 : index
    %c0_2 = arith.constant 0 : index
    %c0_3 = arith.constant 0 : index
    %5 = vector.load %arg3[%c0_1, %c0_2, %c0_3] : memref<3x8x9xf32, #tpu.memory_space<vmem>>, vector<1x8x9xf32>
    %6 = vector.shape_cast %5 : vector<1x8x9xf32> to vector<8x9xf32>
    %7 = vector.extract_strided_slice %4 {offsets = [0, 0], sizes = [9, 1152], strides = [1, 1]} : vector<9x1280xf32> to vector<9x1152xf32>
    %cst = arith.constant dense<0.000000e+00> : vector<8x1152xf32>
    %8 = tpu.matmul %6, %7, %cst {dimension_numbers = #tpu.dot_dimension_numbers<[1], [0], [0], [1], [0, 0, 1, 1], [], []>} : vector<8x9xf32>, vector<9x1152xf32>, vector<8x1152xf32> -> vector<8x1152xf32>
    %c1 = arith.constant 1 : index
    %c0_4 = arith.constant 0 : index
    %c0_5 = arith.constant 0 : index
    %9 = vector.load %arg3[%c1, %c0_4, %c0_5] : memref<3x8x9xf32, #tpu.memory_space<vmem>>, vector<1x8x9xf32>
    %10 = vector.shape_cast %9 : vector<1x8x9xf32> to vector<8x9xf32>
    %11 = vector.extract_strided_slice %4 {offsets = [0, 1], sizes = [9, 1152], strides = [1, 1]} : vector<9x1280xf32> to vector<9x1152xf32>
    %cst_6 = arith.constant dense<0.000000e+00> : vector<8x1152xf32>
    %12 = tpu.matmul %10, %11, %cst_6 {dimension_numbers = #tpu.dot_dimension_numbers<[1], [0], [0], [1], [0, 0, 1, 1], [], []>} : vector<8x9xf32>, vector<9x1152xf32>, vector<8x1152xf32> -> vector<8x1152xf32>
    %13 = arith.addf %8, %12 : vector<8x1152xf32>
    %c2 = arith.constant 2 : index
    %c0_7 = arith.constant 0 : index
    %c0_8 = arith.constant 0 : index
    %14 = vector.load %arg3[%c2, %c0_7, %c0_8] : memref<3x8x9xf32, #tpu.memory_space<vmem>>, vector<1x8x9xf32>
    %15 = vector.shape_cast %14 : vector<1x8x9xf32> to vector<8x9xf32>
    %16 = vector.extract_strided_slice %4 {offsets = [0, 2], sizes = [9, 1152], strides = [1, 1]} : vector<9x1280xf32> to vector<9x1152xf32>
    %cst_9 = arith.constant dense<0.000000e+00> : vector<8x1152xf32>
    %17 = tpu.matmul %15, %16, %cst_9 {dimension_numbers = #tpu.dot_dimension_numbers<[1], [0], [0], [1], [0, 0, 1, 1], [], []>} : vector<8x9xf32>, vector<9x1152xf32>, vector<8x1152xf32> -> vector<8x1152xf32>
    %18 = arith.addf %13, %17 : vector<8x1152xf32>
    %c0_10 = arith.constant 0 : index
    %c0_11 = arith.constant 0 : index
    %19 = vector.load %arg4[%c0_10, %c0_11] : memref<8x1xf32, #tpu.memory_space<vmem>>, vector<8x1xf32>
    %20 = vector.broadcast %19 : vector<8x1xf32> to vector<8x1152xf32>
    %21 = arith.addf %18, %20 : vector<8x1152xf32>
    %cst_12 = arith.constant 5.000000e-01 : f32
    %22 = vector.broadcast %cst_12 : f32 to vector<8x1152xf32>
    %23 = arith.mulf %22, %21 : vector<8x1152xf32>
    %cst_13 = arith.constant 0.0356774069 : f32
    %24 = vector.broadcast %cst_13 : f32 to vector<8x1152xf32>
    %25 = arith.addf %21, %24 : vector<8x1152xf32>
    %26 = arith.mulf %21, %25 : vector<8x1152xf32>
    %27 = math.tanh %26 : vector<8x1152xf32>
    %cst_14 = arith.constant 1.000000e+00 : f32
    %28 = vector.broadcast %cst_14 : f32 to vector<8x1152xf32>
    %29 = arith.addf %27, %28 : vector<8x1152xf32>
    %30 = arith.mulf %23, %29 : vector<8x1152xf32>
    %c0_15 = arith.constant 0 : index
    %c0_16 = arith.constant 0 : index
    %c0_17 = arith.constant 0 : index
    %31 = vector.load %arg5[%c0_15, %c0_16, %c0_17] : memref<1x8x1152xf32, #tpu.memory_space<vmem>>, vector<1x8x1152xf32>
    %32 = vector.shape_cast %31 : vector<1x8x1152xf32> to vector<8x1152xf32>
    %33 = vector.shape_cast %30 : vector<8x1152xf32> to vector<1x8x1152xf32>
    tpu.vector_store %arg5[%c0_15, %c0_16, %c0_17], %33 {strides = array<i32>} : memref<1x8x1152xf32, #tpu.memory_space<vmem>>, vector<1x8x1152xf32>,
    return
  }
  func.func @transform_0(%arg0: i32, %arg1: i32) -> (i32, i32, i32) {
    %c0_i32 = arith.constant 0 : i32
    %c0_i32_0 = arith.constant 0 : i32
    %c0_i32_1 = arith.constant 0 : i32
    return %arg0, %c0_i32, %c0_i32_0 : i32, i32, i32
  }
  func.func @transform_1(%arg0: i32, %arg1: i32) -> (i32, i32, i32) {
    %c0_i32 = arith.constant 0 : i32
    %c0_i32_0 = arith.constant 0 : i32
    %c0_i32_1 = arith.constant 0 : i32
    %c0_i32_2 = arith.constant 0 : i32
    return %c0_i32, %c0_i32_0, %c0_i32_1 : i32, i32, i32
  }
  func.func @transform_2(%arg0: i32, %arg1: i32) -> (i32, i32) {
    %c0_i32 = arith.constant 0 : i32
    %c0_i32_0 = arith.constant 0 : i32
    %c0_i32_1 = arith.constant 0 : i32
    return %c0_i32, %c0_i32_0 : i32, i32
  }
  func.func @transform_3(%arg0: i32, %arg1: i32) -> (i32, i32, i32) {
    %c0_i32 = arith.constant 0 : i32
    %c0_i32_0 = arith.constant 0 : i32
    return %arg0, %c0_i32, %arg1 : i32, i32, i32
  }
}

</mosaic_0001>

<bundles_post_ra>
// kernel: fused_model.1
= control target key start
LH: loop header
LB: loop body
LE: loop exit
PB: predicated region body
PF: predicated region fallthrough
CT: control target
= control target key end

     0   :  { %s1859_s12 = smov 0   ;;  %s1861_s13 = smov 0   ;;  %s2174_s0 = inlined_call_operand.vmem [shape: f32[2,9,1280], index: 0, kind: input, shape index: {}]   ;;  %s2175_s1 = inlined_call_operand.vmem [shape: f32[3,8,9], index: 1, kind: input, shape index: {}]   ;;  %s2176_s2 = inlined_call_operand.vmem [shape: f32[8,1], index: 2, kind: input, shape index: {}]   ;;  %s2177_s3 = inlined_call_operand.vmem [shape: f32[2,8,1152], index: 3, kind: output, shape index: {}]  }
   0x1   :  { %s1863_s14 = smov 0  }
   0x2 LB: > { %s25_s15 = sadd.s32 1, %s1828_s13  ;;  %p1681_p0 = scmp.ge.s32.totalorder %s1832_s14, 1  ;;  %s1832_s14 = sphi %s1863_s14, %s13_s14   ;;  %s1828_s13 = sphi %s1861_s13, %s2179_s13   ;;  %s1824_s12 = sphi %s1859_s12, %s2178_s12  }
   0x3   : > { %p27_p1 = scmp.ge.s32.totalorder %s25_s15, 2  ;;  %p151_p2 = scmp.lt.s32.totalorder %s1832_s14, 3 }
   0x5   : > { %s2181_s15 = smov (%p27_p1, %s25_s15), 0  ;;  %p152_p3 = pnand %p1681_p0, %p151_p2 }
   0x6   : > { %p179_p4 = scmp.lt.s32.totalorder (!%p152_p3), %s1824_s12, 1  ;;  %s1834_s20 = smov (!%p152_p3), 127  }
   0x7   : > { %155 = sbr.rel (%p152_p3) target bundleno = 432 (0x1b0), region = 32  ;;  %s1836_s21 = smov (!%p152_p3), 126  }
   0xc   : > { %s2183_s12 = smov (!%p179_p4, %s1824_s12), 1  ;;  %v1835_v8 = vmov 0.0   ;;  %v1837_v21 = vmov 0   ;;  %v1516_v22 = vld [vmem:[%s2176_s2] sm:$0xff]  ;;  %vm282_vm0 = vcmask 1039360   ;;  %vm314_vm1 = vcmask 1040384  }
   0xd   : > { %s1760_s16 = smul.u32 160, %s2183_s12  ;;  %397 = vmatprep.mubr.f32.mxu0 %v1835_v8  ;;  %468 = vmatprep.mubr.f32.mxu1 %v1835_v8  ;;  %v2010_v34 = vld [vmem:[%s2175_s1 + $0x8] sm:$0xff]  ;;  %vm310_vm2 = vcmask 72704   ;;  %vm1838_vm3 = vmmov 0   ;;  %vm1104_vm4 = vcmask 1031168  }
   0xe   : > { %1791 = vset.pattern.permute.xlu0 %v1837_v21  ;;  %s1761_s30 = smul.u32 72, %s2183_s12 }
   0xf   : > { %s1883_s19 = scalar_lea.vmem %s2174_s0, %s1760_s16 }
  0x10   : > { %v1886_v0 = vld [vmem:[%s1883_s19 + $0x58] sm:$0x1]  ;;  %v1889_v1 = vld [vmem:[%s1883_s19 + $0x50] sm:$0x1]  ;;  %v1896_v2 = vld [vmem:[%s1883_s19 + $0x60] sm:$0x1]  ;;  %s2152_s6 = scalar_lea.vmem %s2177_s3, %s1761_s30 }
  0x11   : > { %264 = vrot.lane.b32.xlu0 %v1886_v0, %s1834_s20  ;;  %262 = vrot.lane.b32.xlu1 %v1889_v1, %s1834_s20  ;;  %v1899_v3 = vld [vmem:[%s1883_s19 + $0x8] sm:$0xff]  ;;  %v1906_v4 = vld [vmem:[%s1883_s19 + $0x10] sm:$0xff] }
  0x12   : > { %v1909_v5 = vld [vmem:[%s1883_s19 + $0x68] sm:$0x1]  ;;  %v1916_v6 = vld [vmem:[%s1883_s19 + $0x70] sm:$0x1]  ;;  %v1919_v7 = vld [vmem:[%s1883_s19] sm:$0xff] }
  0x13   : > { %v1928_v9 = vld [vmem:[%s1883_s19 + $0x18] sm:$0xff]  ;;  %v1931_v10 = vld [vmem:[%s1883_s19 + $0x20] sm:$0xff]  ;;  %v1948_v13 = vld [vmem:[%s1883_s19 + $0x28] sm:$0xff] }
  0x14   : > { %v1938_v11 = vld [vmem:[%s1883_s19 + $0x78] sm:$0x1]  ;;  %v1941_v12 = vld [vmem:[%s1883_s19 + $0x80] sm:$0x1]  ;;  %v1951_v14 = vld [vmem:[%s1883_s19 + $0x30] sm:$0xff] }
  0x15   : > { %266 = vrot.lane.b32.xlu0 %v1896_v2, %s1834_s20  ;;  %244 = vrot.lane.b32.xlu1 %v1899_v3, %s1834_s20  ;;  %v1958_v15 = vld [vmem:[%s1883_s19 + $0x88] sm:$0x1]  ;;  %v1961_v16 = vld [vmem:[%s1883_s19 + $0x90] sm:$0x1] }
  0x16   : > { %v1968_v17 = vld [vmem:[%s1883_s19 + $0x38] sm:$0xff]  ;;  %v1971_v18 = vld [vmem:[%s1883_s19 + $0x40] sm:$0xff]  ;;  %v208_v20 = vld [vmem:[%s1883_s19 + $0x48] sm:$0xff] }
  0x17   : > { %v218_v19 = vld [vmem:[%s1883_s19 + $0x98] sm:$0x1] }
  0x19   : > { %246 = vrot.lane.b32.xlu0 %v1906_v4, %s1834_s20  ;;  %268 = vrot.lane.b32.xlu1 %v1909_v5, %s1834_s20 }
  0x1d   : > { %270 = vrot.lane.b32.xlu0 %v1916_v6, %s1834_s20  ;;  %242 = vrot.lane.b32.xlu1 %v1919_v7, %s1834_s20 }
  0x21   : > { %248 = vrot.lane.b32.xlu0 %v1928_v9, %s1834_s20  ;;  %250 = vrot.lane.b32.xlu1 %v1931_v10, %s1834_s20 }
  0x25   : > { %272 = vrot.lane.b32.xlu0 %v1938_v11, %s1834_s20  ;;  %274 = vrot.lane.b32.xlu1 %v1941_v12, %s1834_s20 }
  0x29   : > { %252 = vrot.lane.b32.xlu0 %v1948_v13, %s1834_s20  ;;  %254 = vrot.lane.b32.xlu1 %v1951_v14, %s1834_s20 }
  0x2d   : > { %276 = vrot.lane.b32.xlu0 %v1958_v15, %s1834_s20  ;;  %278 = vrot.lane.b32.xlu1 %v1961_v16, %s1834_s20 }
  0x31   : > { %256 = vrot.lane.b32.xlu0 %v1968_v17, %s1834_s20  ;;  %258 = vrot.lane.b32.xlu1 %v1971_v18, %s1834_s20 }
  0x35   : > { %280 = vrot.lane.b32.xlu0 %v218_v19, %s1834_s20  ;;  %260 = vrot.lane.b32.xlu1 %v208_v20, %s1834_s20 }
  0x39   : > { %1086 = vrot.lane.b32.xlu0 %v1886_v0, %s1836_s21  ;;  %1088 = vrot.lane.b32.xlu1 %v1896_v2, %s1836_s21 }
  0x3d   : > { %1084 = vrot.lane.b32.xlu0 %v1889_v1, %s1836_s21  ;;  %1066 = vrot.lane.b32.xlu1 %v1899_v3, %s1836_s21 }
  0x41   : > { %1068 = vrot.lane.b32.xlu0 %v1906_v4, %s1836_s21  ;;  %1090 = vrot.lane.b32.xlu1 %v1909_v5, %s1836_s21 }
  0x45   : > { %1092 = vrot.lane.b32.xlu0 %v1916_v6, %s1836_s21  ;;  %1064 = vrot.lane.b32.xlu1 %v1919_v7, %s1836_s21 }
  0x49   : > { %1070 = vrot.lane.b32.xlu0 %v1928_v9, %s1836_s21  ;;  %1072 = vrot.lane.b32.xlu1 %v1931_v10, %s1836_s21 }
  0x4d   : > { %1094 = vrot.lane.b32.xlu0 %v1938_v11, %s1836_s21  ;;  %1096 = vrot.lane.b32.xlu1 %v1941_v12, %s1836_s21 }
  0x51   : > { %1074 = vrot.lane.b32.xlu0 %v1948_v13, %s1836_s21  ;;  %1076 = vrot.lane.b32.xlu1 %v1951_v14, %s1836_s21 }
  0x55   : > { %1098 = vrot.lane.b32.xlu0 %v1958_v15, %s1836_s21  ;;  %1100 = vrot.lane.b32.xlu1 %v1961_v16, %s1836_s21 }
  0x59   : > { %1078 = vrot.lane.b32.xlu0 %v1968_v17, %s1836_s21  ;;  %1080 = vrot.lane.b32.xlu1 %v1971_v18, %s1836_s21 }
  0x5d   : > { %1102 = vrot.lane.b32.xlu0 %v218_v19, %s1836_s21  ;;  %1082 = vrot.lane.b32.xlu1 %v208_v20, %s1836_s21 }
  0x61   : > { %1519 = vperm.xlu0 %1791, %v1516_v22  }
  0x83   : > { %v265_v23 = vpop.permute.xlu0 %264  ;;  %v263_v24 = vpop.permute.xlu1 %262 }
  0x84   : > { %v292_v28 = vsel %vm282_vm0, %v263_v24, %v265_v23 }
  0x87   : > { %v267_v25 = vpop.permute.xlu0 %266  ;;  %v245_v26 = vpop.permute.xlu1 %244 }
  0x88   : > { %v293_v27 = vsel %vm282_vm0, %v265_v23, %v267_v25 }
  0x89   : > { %1685 = vmatprep.subr.msk.mxu0 %vm314_vm1, %v293_v27 }
  0x8a   : > { %1686 = vmatpush1.msk.msra.mxu0 %vm314_vm1, %v292_v28 }
  0x8b   : > { %v247_v29 = vpop.permute.xlu0 %246  ;;  %v269_v30 = vpop.permute.xlu1 %268 }
  0x8c   : > { %v284_v31 = vsel %vm282_vm0, %v245_v26, %v247_v29  ;;  %v294_v37 = vsel %vm282_vm0, %v267_v25, %v269_v30 }
  0x8d   : > { %363 = vmatprep.subr.mxu0 %v284_v31 }
  0x8f   : > { %v271_v32 = vpop.permute.xlu0 %270  ;;  %v243_v33 = vpop.permute.xlu1 %242 }
  0x90   : > { %v283_v35 = vsel %vm282_vm0, %v243_v33, %v245_v26  ;;  %v295_v36 = vsel %vm282_vm0, %v269_v30, %v271_v32 }
  0x91   : > { %364 = vmatpush1.msra.mxu0 %v283_v35  ;;  %1688 = vmatprep.subr.msk.mxu1 %vm314_vm1, %v295_v36 }
  0x92   : > { %1689 = vmatpush1.msk.msra.mxu1 %vm314_vm1, %v294_v37  ;;  %1687 = vmatmul.mubr.msk.f32.vlgmr.msra.gmra.mxu0 %vm310_vm2, %v2010_v34 }
  0x93   : > { %v249_v38 = vpop.permute.xlu0 %248  ;;  %v251_v39 = vpop.permute.xlu1 %250  ;;  %539 = vmatprep.mubr.f32.mxu0 %v1835_v8 }
  0x94   : > { %v286_v40 = vsel %vm282_vm0, %v249_v38, %v251_v39  ;;  %v285_v41 = vsel %vm282_vm0, %v247_v29, %v249_v38 }
  0x95   : > { %434 = vmatprep.subr.mxu1 %v286_v40 }
  0x96   : > { %435 = vmatpush1.msra.mxu1 %v285_v41 }
  0x97   : > { %v273_v42 = vpop.permute.xlu0 %272  ;;  %v275_v43 = vpop.permute.xlu1 %274  ;;  %1690 = vmatmul.mubr.msk.f32.vlgmr.msra.gmra.mxu1 %vm310_vm2, %v2010_v34 }
  0x98   : > { %v296_v44 = vsel %vm282_vm0, %v271_v32, %v273_v42  ;;  %v297_v45 = vsel %vm282_vm0, %v273_v42, %v275_v43  ;;  %610 = vmatprep.mubr.f32.mxu1 %v1835_v8 }
  0x99   : > { %1691 = vmatprep.subr.msk.mxu0 %vm314_vm1, %v297_v45 }
  0x9a   : > { %1692 = vmatpush1.msk.msra.mxu0 %vm314_vm1, %v296_v44 }
  0x9b   : > { %v253_v46 = vpop.permute.xlu0 %252  ;;  %v255_v47 = vpop.permute.xlu1 %254 }
  0x9c   : > { %v287_v48 = vsel %vm282_vm0, %v251_v39, %v253_v46  ;;  %v288_v49 = vsel %vm282_vm0, %v253_v46, %v255_v47 }
  0x9d   : > { %505 = vmatprep.subr.mxu0 %v288_v49 }
  0x9e   : > { %506 = vmatpush1.msra.mxu0 %v287_v48 }
  0x9f   : > { %v277_v50 = vpop.permute.xlu0 %276  ;;  %v279_v51 = vpop.permute.xlu1 %278  ;;  %1739 = vmatprep.subr.mxu0 %v1835_v8  ;;  %1693 = vmatmul.mubr.msk.f32.vlgmr.msra.gmra.mxu0 %vm310_vm2, %v2010_v34 }
  0xa0   : > { %v298_v52 = vsel %vm282_vm0, %v275_v43, %v277_v50  ;;  %v299_v53 = vsel %vm282_vm0, %v277_v50, %v279_v51  ;;  %1743 = vmatprep.mubr.msk.f32.mxu0 %vm1838_vm3, %v1835_v8 }
  0xa1   : > { %1694 = vmatprep.subr.msk.mxu1 %vm314_vm1, %v299_v53 }
  0xa2   : > { %1695 = vmatpush1.msk.msra.mxu1 %vm314_vm1, %v298_v52 }
  0xa3   : > { %v257_v54 = vpop.permute.xlu0 %256  ;;  %v259_v55 = vpop.permute.xlu1 %258 }
  0xa4   : > { %v289_v56 = vsel %vm282_vm0, %v255_v47, %v257_v54  ;;  %v290_v57 = vsel %vm282_vm0, %v257_v54, %v259_v55 }
  0xa5   : > { %576 = vmatprep.subr.mxu1 %v290_v57 }
  0xa6   : > { %577 = vmatpush1.msra.mxu1 %v289_v56 }
  0xa7   : > { %v281_v58 = vpop.permute.xlu0 %280  ;;  %v261_v59 = vpop.permute.xlu1 %260  ;;  %1699 = vmatprep.subr.msk.mxu1 %vm314_vm1, %v1886_v0  ;;  %1696 = vmatmul.mubr.msk.f32.vlgmr.msra.gmra.mxu1 %vm310_vm2, %v2010_v34  ;;  %v219_v0 = vld [vmem:[%s2175_s1] sm:$0xff] }
  0xa8   : > { %v300_v60 = vsel %vm282_vm0, %v279_v51, %v281_v58  ;;  %1700 = vmatpush1.msk.msra.mxu1 %vm314_vm1, %v1889_v1  ;;  %772 = vmatprep.mubr.f32.mxu1 %v1835_v8  ;;  %v291_v61 = vsel %vm282_vm0, %v259_v55, %v261_v59 }
  0xa9   : > { %1740 = vmatpush3.msk.msra.mxu0 %vm314_vm1, %v300_v60  ;;  %738 = vmatprep.subr.mxu1 %v1899_v3 }
  0xaa   : > { %1741 = vmatprep.subr.mxu0 %v1835_v8  ;;  %739 = vmatpush1.msra.mxu1 %v1919_v7 }
  0xab   : > { %v1087_v62 = vpop.permute.xlu0 %1086  ;;  %1742 = vmatpush3.msra.mxu0 %v291_v61  ;;  %v1089_v63 = vpop.permute.xlu1 %1088  ;;  %1705 = vmatprep.subr.msk.mxu1 %vm314_vm1, %v1938_v11 }
  0xac   : > { %1702 = vmatprep.subr.msk.mxu0 %vm314_vm1, %v1909_v5  ;;  %1744 = vmatmul.mubr.msk.f32.vlgmr.msra.gmra.mxu0 %vm310_vm2, %v2010_v34 }
  0xad   : > { %1703 = vmatpush1.msk.msra.mxu0 %vm314_vm1, %v1896_v2  ;;  %843 = vmatprep.mubr.f32.mxu0 %v1835_v8  ;;  %v1115_v2 = vsel %vm1104_vm4, %v1087_v62, %v1089_v63 }
  0xae   : > { %809 = vmatprep.subr.mxu0 %v1928_v9  ;;  %1701 = vmatmul.mubr.msk.f32.vlgmr.msra.gmra.mxu1 %vm310_vm2, %v219_v0 }
  0xaf   : > { %v1085_v1 = vpop.permute.xlu0 %1084  ;;  %810 = vmatpush1.msra.mxu0 %v1906_v4  ;;  %v1067_v3 = vpop.permute.xlu1 %1066  ;;  %1706 = vmatpush1.msk.msra.mxu1 %vm314_vm1, %v1916_v6 }
  0xb0   : > { %1708 = vmatprep.subr.msk.mxu0 %vm314_vm1, %v1958_v15  ;;  %1704 = vmatmul.mubr.msk.f32.vlgmr.msra.gmra.mxu0 %vm310_vm2, %v219_v0  ;;  %v1114_v7 = vsel %vm1104_vm4, %v1085_v1, %v1087_v62 }
  0xb1   : > { %1709 = vmatpush1.msk.msra.mxu0 %vm314_vm1, %v1941_v12  ;;  %880 = vmatprep.subr.mxu1 %v1948_v13  ;;  %v1713_v13 = vld [vmem:[%s2175_s1 + $0x10] sm:$0xff] }
  0xb2   : > { %951 = vmatprep.subr.mxu0 %v1968_v17  ;;  %881 = vmatpush1.msra.mxu1 %v1931_v10 }
  0xb3   : > { %v1069_v4 = vpop.permute.xlu0 %1068  ;;  %952 = vmatpush1.msra.mxu0 %v1951_v14  ;;  %v1091_v5 = vpop.permute.xlu1 %1090  ;;  %985 = vmatprep.mubr.f32.mxu0 %v1835_v8 }
  0xb4   : > { %1714 = vmatprep.subr.msk.mxu0 %vm314_vm1, %v1115_v2  ;;  %914 = vmatprep.mubr.f32.mxu1 %v1835_v8  ;;  %v1106_v6 = vsel %vm1104_vm4, %v1067_v3, %v1069_v4  ;;  %v1116_v14 = vsel %vm1104_vm4, %v1089_v63, %v1091_v5 }
  0xb5   : > { %1710 = vmatmul.mubr.msk.f32.vlgmr.msra.gmra.mxu0 %vm310_vm2, %v219_v0  ;;  %1746 = vmatprep.subr.mxu1 %v1835_v8 }
  0xb6   : > { %1715 = vmatpush1.msk.msra.mxu0 %vm314_vm1, %v1114_v7  ;;  %1707 = vmatmul.mubr.msk.f32.vlgmr.msra.gmra.mxu1 %vm310_vm2, %v219_v0 }
  0xb7   : > { %1747 = vmatpush3.msk.msra.mxu1 %vm314_vm1, %v1961_v16  ;;  %1183 = vmatprep.subr.mxu0 %v1106_v6  ;;  %v1093_v9 = vpop.permute.xlu0 %1092  ;;  %v1065_v10 = vpop.permute.xlu1 %1064 }
  0xb8   : > { %v1117_v11 = vsel %vm1104_vm4, %v1091_v5, %v1093_v9  ;;  %1748 = vmatprep.subr.mxu1 %v1835_v8  ;;  %v1105_v12 = vsel %vm1104_vm4, %v1065_v10, %v1067_v3  ;;  %1750 = vmatprep.mubr.msk.f32.mxu1 %vm1838_vm3, %v1835_v8 }
  0xb9   : > { %1749 = vmatpush3.msra.mxu1 %v1971_v18  ;;  %1184 = vmatpush1.msra.mxu0 %v1105_v12 }
  0xba   : > { %1217 = vmatprep.mubr.f32.mxu0 %v1835_v8  ;;  %1717 = vmatprep.subr.msk.mxu1 %vm314_vm1, %v1117_v11 }
  0xbb   : > { %1751 = vmatmul.mubr.msk.f32.vlgmr.msra.gmra.mxu1 %vm310_vm2, %v219_v0  ;;  %1716 = vmatmul.mubr.msk.f32.vlgmr.msra.gmra.mxu0 %vm310_vm2, %v1713_v13  ;;  %v1071_v15 = vpop.permute.xlu0 %1070  ;;  %v1073_v16 = vpop.permute.xlu1 %1072 }
  0xbc   : > { %1718 = vmatpush1.msk.msra.mxu1 %vm314_vm1, %v1116_v14  ;;  %v1107_v17 = vsel %vm1104_vm4, %v1069_v4, %v1071_v15  ;;  %v1108_v19 = vsel %vm1104_vm4, %v1071_v15, %v1073_v16  ;;  %1288 = vmatprep.mubr.f32.mxu1 %v1835_v8 }
  0xbd   : > { %1254 = vmatprep.subr.mxu1 %v1108_v19  ;;  %1359 = vmatprep.mubr.f32.mxu0 %v1835_v8 }
  0xbe   : > { %1255 = vmatpush1.msra.mxu1 %v1107_v17 }
  0xbf   : > { %v1095_v18 = vpop.permute.xlu0 %1094  ;;  %1719 = vmatmul.mubr.msk.f32.vlgmr.msra.gmra.mxu1 %vm310_vm2, %v1713_v13  ;;  %v1097_v20 = vpop.permute.xlu1 %1096 }
  0xc0   : > { %v1118_v21 = vsel %vm1104_vm4, %v1093_v9, %v1095_v18  ;;  %v1119_v22 = vsel %vm1104_vm4, %v1095_v18, %v1097_v20  ;;  %1430 = vmatprep.mubr.f32.mxu1 %v1835_v8 }
  0xc1   : > { %1720 = vmatprep.subr.msk.mxu0 %vm314_vm1, %v1119_v22 }
  0xc2   : > { %1721 = vmatpush1.msk.msra.mxu0 %vm314_vm1, %v1118_v21 }
  0xc3   : > { %v1075_v23 = vpop.permute.xlu0 %1074  ;;  %v1077_v24 = vpop.permute.xlu1 %1076 }
  0xc4   : > { %v1109_v25 = vsel %vm1104_vm4, %v1073_v16, %v1075_v23  ;;  %v1110_v26 = vsel %vm1104_vm4, %v1075_v23, %v1077_v24 }
  0xc5   : > { %1325 = vmatprep.subr.mxu0 %v1110_v26 }
  0xc6   : > { %1326 = vmatpush1.msra.mxu0 %v1109_v25 }
  0xc7   : > { %v1099_v27 = vpop.permute.xlu0 %1098  ;;  %1722 = vmatmul.mubr.msk.f32.vlgmr.msra.gmra.mxu0 %vm310_vm2, %v1713_v13  ;;  %v1101_v28 = vpop.permute.xlu1 %1100  ;;  %1753 = vmatprep.subr.mxu0 %v1835_v8 }
  0xc8   : > { %v1120_v29 = vsel %vm1104_vm4, %v1097_v20, %v1099_v27  ;;  %v1121_v30 = vsel %vm1104_vm4, %v1099_v27, %v1101_v28  ;;  %1757 = vmatprep.mubr.msk.f32.mxu0 %vm1838_vm3, %v1835_v8 }
  0xc9   : > { %1723 = vmatprep.subr.msk.mxu1 %vm314_vm1, %v1121_v30 }
  0xca   : > { %1724 = vmatpush1.msk.msra.mxu1 %vm314_vm1, %v1120_v29 }
  0xcb   : > { %v1079_v31 = vpop.permute.xlu0 %1078  ;;  %v1081_v32 = vpop.permute.xlu1 %1080 }
  0xcc   : > { %v1111_v33 = vsel %vm1104_vm4, %v1077_v24, %v1079_v31  ;;  %v1112_v34 = vsel %vm1104_vm4, %v1079_v31, %v1081_v32 }
  0xcd   : > { %1396 = vmatprep.subr.mxu1 %v1112_v34 }
  0xce   : > { %1397 = vmatpush1.msra.mxu1 %v1111_v33 }
  0xcf   : > { %v1103_v35 = vpop.permute.xlu0 %1102  ;;  %1725 = vmatmul.mubr.msk.f32.vlgmr.msra.gmra.mxu1 %vm310_vm2, %v1713_v13  ;;  %v1083_v36 = vpop.permute.xlu1 %1082 }
  0xd0   : > { %v1122_v37 = vsel %vm1104_vm4, %v1101_v28, %v1103_v35  ;;  %v1113_v38 = vsel %vm1104_vm4, %v1081_v32, %v1083_v36 }
  0xd1   : > { %1754 = vmatpush3.msk.msra.mxu0 %vm314_vm1, %v1122_v37 }
  0xd2   : > { %1755 = vmatprep.subr.mxu0 %v1835_v8 }
  0xd3   : > { %1756 = vmatpush3.msra.mxu0 %v1113_v38 }
  0xd4   : > { %1758 = vmatmul.mubr.msk.f32.vlgmr.msra.gmra.mxu0 %vm310_vm2, %v1713_v13 }
  0xdc   : > { %v2138_v57 = vpop.permute.xlu0 %1519 }
 0x152   : > { %v399_v39 = vpop.f32.mrf.mxu0 }
 0x154   : > { %v401_v41 = vpop.f32.mrf.mxu0 }
 0x157   : > { %v470_v40 = vpop.f32.mrf.mxu1 }
 0x159   : > { %v472_v42 = vpop.f32.mrf.mxu1 }
 0x15f   : > { %v541_v43 = vpop.f32.mrf.mxu0 }
 0x161   : > { %v543_v45 = vpop.f32.mrf.mxu0 }
 0x167   : > { %v612_v44 = vpop.f32.mrf.mxu1 }
 0x169   : > { %v614_v46 = vpop.f32.mrf.mxu1 }
 0x16c   : > { %v2136_v47 = vpop.f32.mrf.mxu0 }
 0x16e   : > { %v1745_v48 = vpop.f32.mrf.mxu0  ;;  %v774_v49 = vpop.f32.mrf.mxu1 }
 0x16f   : > { %v775_v55 = vadd.f32 %v774_v49, %v399_v39 }
 0x170   : > { %v845_v50 = vpop.f32.mrf.mxu0  ;;  %v776_v52 = vpop.f32.mrf.mxu1 }
 0x171   : > { %v777_v60 = vadd.f32 %v776_v52, %v401_v41  ;;  %v846_v0 = vadd.f32 %v845_v50, %v470_v40 }
 0x172   : > { %v847_v51 = vpop.f32.mrf.mxu0 }
 0x173   : > { %v848_v7 = vadd.f32 %v847_v51, %v472_v42 }
 0x175   : > { %v987_v53 = vpop.f32.mrf.mxu0 }
 0x176   : > { %v916_v8 = vpop.f32.mrf.mxu1  ;;  %v988_v29 = vadd.f32 %v987_v53, %v612_v44 }
 0x177   : > { %v989_v54 = vpop.f32.mrf.mxu0  ;;  %v917_v17 = vadd.f32 %v916_v8, %v541_v43 }
 0x178   : > { %v918_v56 = vpop.f32.mrf.mxu1  ;;  %v990_v33 = vadd.f32 %v989_v54, %v614_v46 }
 0x179   : > { %v919_v21 = vadd.f32 %v918_v56, %v543_v45 }
 0x17b   : > { %v1219_v58 = vpop.f32.mrf.mxu0  ;;  %v1058_v59 = vpop.f32.mrf.mxu1 }
 0x17c   : > { %v1507_v61 = vadd.f32 %v1219_v58, %v775_v55  ;;  %v1059_v43 = vadd.f32 %v1058_v59, %v2136_v47 }
 0x17d   : > { %v1221_v62 = vpop.f32.mrf.mxu0  ;;  %v1752_v63 = vpop.f32.mrf.mxu1 }
 0x17e   : > { %v1522_v1 = vadd.f32 %v2138_v57, %v1507_v61  ;;  %v1508_v3 = vadd.f32 %v1221_v62, %v777_v60 }
 0x17f   : > { %v1290_v2 = vpop.f32.mrf.mxu1 }
 0x180   : > { %v1540_v4 = vadd.f32 0.035677407, %v1522_v1  ;;  %v1523_v5 = vadd.f32 %v2138_v57, %v1508_v3  ;;  %v1509_v6 = vadd.f32 %v1290_v2, %v846_v0  ;;  %v1531_v37 = vmul.f32 0.5, %v1522_v1 }
 0x181   : > { %v1292_v9 = vpop.f32.mrf.mxu1 }
 0x182   : > { %v1549_v10 = vmul.f32 %v1540_v4, %v1522_v1  ;;  %v1541_v11 = vadd.f32 0.035677407, %v1523_v5  ;;  %v1524_v12 = vadd.f32 %v2138_v57, %v1509_v6  ;;  %v1510_v13 = vadd.f32 %v1292_v9, %v848_v7 }
 0x183   : > { %v1532_v45 = vmul.f32 0.5, %v1523_v5 }
 0x184   : > { %1792 = vtanh.f32 %v1549_v10  ;;  %v1550_v14 = vmul.f32 %v1541_v11, %v1523_v5  ;;  %v1542_v15 = vadd.f32 0.035677407, %v1524_v12  ;;  %v1525_v16 = vadd.f32 %v2138_v57, %v1510_v13 }
 0x185   : > { %v1533_v47 = vmul.f32 0.5, %v1524_v12 }
 0x186   : > { %1794 = vtanh.f32 %v1550_v14  ;;  %v1551_v19 = vmul.f32 %v1542_v15, %v1524_v12  ;;  %v1543_v18 = vadd.f32 0.035677407, %v1525_v16  ;;  %v1534_v61 = vmul.f32 0.5, %v1525_v16 }
 0x187   : > { %v1361_v20 = vpop.f32.mrf.mxu0 }
 0x188   : > { %1796 = vtanh.f32 %v1551_v19  ;;  %v1511_v22 = vadd.f32 %v1361_v20, %v917_v17  ;;  %v1552_v23 = vmul.f32 %v1543_v18, %v1525_v16 }
 0x189   : > { %v1363_v24 = vpop.f32.mrf.mxu0 }
 0x18a   : > { %v1526_v25 = vadd.f32 %v2138_v57, %v1511_v22  ;;  %v1512_v26 = vadd.f32 %v1363_v24, %v919_v21  ;;  %1798 = vtanh.f32 %v1552_v23 }
 0x18c   : > { %v1544_v27 = vadd.f32 0.035677407, %v1526_v25  ;;  %v1527_v28 = vadd.f32 %v2138_v57, %v1512_v26  ;;  %v1535_v4 = vmul.f32 0.5, %v1526_v25 }
 0x18e   : > { %v1553_v30 = vmul.f32 %v1544_v27, %v1526_v25  ;;  %v1545_v31 = vadd.f32 0.035677407, %v1527_v28  ;;  %v1536_v7 = vmul.f32 0.5, %v1527_v28 }
 0x18f   : > { %v1432_v32 = vpop.f32.mrf.mxu1 }
 0x190   : > { %1800 = vtanh.f32 %v1553_v30  ;;  %v1554_v34 = vmul.f32 %v1545_v31, %v1527_v28  ;;  %v1513_v35 = vadd.f32 %v1432_v32, %v988_v29 }
 0x191   : > { %v1793_v36 = vpop.eup %1792  ;;  %v1434_v38 = vpop.f32.mrf.mxu1 }
 0x192   : > { %v1567_v39 = vadd.f32 1.0, %v1793_v36  ;;  %1802 = vtanh.f32 %v1554_v34  ;;  %v1528_v40 = vadd.f32 %v2138_v57, %v1513_v35  ;;  %v1514_v41 = vadd.f32 %v1434_v38, %v990_v33 }
 0x193   : > { %v1795_v42 = vpop.eup %1794 }
 0x194   : > { %v1576_v44 = vmul.f32 %v1567_v39, %v1531_v37  ;;  %v1568_v46 = vadd.f32 1.0, %v1795_v42  ;;  %v1546_v48 = vadd.f32 0.035677407, %v1528_v40  ;;  %v1503_v49 = vpop.f32.mrf.mxu0  ;;  %v1529_v51 = vadd.f32 %v2138_v57, %v1514_v41 }
 0x195   : > { %v1797_v50 = vpop.eup %1796  ;;  %v1515_v52 = vadd.f32 %v1503_v49, %v1059_v43  ;;  %v1537_v12 = vmul.f32 0.5, %v1528_v40 }
 0x196   : > { %1585 = vst [vmem:[%s2152_s6] sm:$0xff] %v1576_v44  ;;  %v1577_v53 = vmul.f32 %v1568_v46, %v1532_v45  ;;  %v1569_v8 = vadd.f32 1.0, %v1797_v50  ;;  %v1555_v54 = vmul.f32 %v1546_v48, %v1528_v40  ;;  %v1759_v55 = vpop.f32.mrf.mxu0  ;;  %v1547_v56 = vadd.f32 0.035677407, %v1529_v51 }
 0x197   : > { %v1530_v58 = vadd.f32 %v2138_v57, %v1515_v52  ;;  %v1799_v59 = vpop.eup %1798  ;;  %v1538_v16 = vmul.f32 0.5, %v1529_v51 }
 0x198   : > { %1586 = vst [vmem:[%s2152_s6 + $0x8] sm:$0xff] %v1577_v53  ;;  %v1578_v60 = vmul.f32 %v1569_v8, %v1533_v47  ;;  %1804 = vtanh.f32 %v1555_v54  ;;  %v1570_v62 = vadd.f32 1.0, %v1799_v59  ;;  %v1556_v63 = vmul.f32 %v1547_v56, %v1529_v51 }
 0x199   : > { %v1548_v0 = vadd.f32 0.035677407, %v1530_v58  ;;  %v1539_v20 = vmul.f32 0.5, %v1530_v58 }
 0x19a   : > { %1587 = vst [vmem:[%s2152_s6 + $0x10] sm:$0xff] %v1578_v60  ;;  %v1579_v1 = vmul.f32 %v1570_v62, %v1534_v61  ;;  %1806 = vtanh.f32 %v1556_v63 }
 0x19b   : > { %v1557_v3 = vmul.f32 %v1548_v0, %v1530_v58 }
 0x19c   : > { %1588 = vst [vmem:[%s2152_s6 + $0x18] sm:$0xff] %v1579_v1 }
 0x19d   : > { %v1801_v2 = vpop.eup %1800  ;;  %1808 = vtanh.f32 %v1557_v3 }
 0x19e   : > { %v1571_v5 = vadd.f32 1.0, %v1801_v2 }
 0x19f   : > { %v1803_v57 = vpop.eup %1802 }
 0x1a0   : > { %v1580_v6 = vmul.f32 %v1571_v5, %v1535_v4  ;;  %v1572_v9 = vadd.f32 1.0, %v1803_v57 }
 0x1a2   : > { %1589 = vst [vmem:[%s2152_s6 + $0x20] sm:$0xff] %v1580_v6  ;;  %v1581_v10 = vmul.f32 %v1572_v9, %v1536_v7 }
 0x1a4   : > { %1590 = vst [vmem:[%s2152_s6 + $0x28] sm:$0xff] %v1581_v10 }
 0x1a5   : > { %v1805_v11 = vpop.eup %1804 }
 0x1a6   : > { %v1573_v13 = vadd.f32 1.0, %v1805_v11 }
 0x1a7   : > { %v1807_v14 = vpop.eup %1806 }
 0x1a8   : > { %v1582_v15 = vmul.f32 %v1573_v13, %v1537_v12  ;;  %v1574_v17 = vadd.f32 1.0, %v1807_v14 }
 0x1aa   : > { %v1809_v19 = vpop.eup %1808  ;;  %1591 = vst [vmem:[%s2152_s6 + $0x30] sm:$0xff] %v1582_v15  ;;  %v1583_v18 = vmul.f32 %v1574_v17, %v1538_v16 }
 0x1ab   : > { %v1575_v21 = vadd.f32 1.0, %v1809_v19 }
 0x1ac   : > { %1592 = vst [vmem:[%s2152_s6 + $0x38] sm:$0xff] %v1583_v18 }
 0x1ad   : > { %v1584_v22 = vmul.f32 %v1575_v21, %v1539_v20 }
 0x1af   : > { %1593 = vst [vmem:[%s2152_s6 + $0x40] sm:$0xff] %v1584_v22 }
 0x1b0 PF: > { %s13_s14 = sadd.s32 1, %s1832_s14   ;;  %s2178_s12 = smov %s1828_s13 }
 0x1b1   : > { %p10_p5 = scmp.ge.s32.totalorder %s13_s14, 4   ;;  %s2179_s13 = smov %s2181_s15 }
 0x1b3   :  { %12 = sbr.rel (!%p10_p5) target bundleno = 2 (0x2), region = 65 }

</bundles_post_ra>
